<compile_context>
chip_gen: v7x
topology: tpu7x:2x2x1
jax: 0.10.0
libtpu: 0.0.40
codegen_flags: <defaults>
</compile_context>

<pallas_src>
import numpy as np
import jax
import jax.numpy as jnp
from jax.experimental import pallas as pl
from jax.experimental.pallas import tpu as pltpu


# ----------------------------------------------------------------------------
# VMEM budgeting & tile selection
# ----------------------------------------------------------------------------
def _usable_vmem_bytes():
    """~85% of the chip's physical VMEM (v5e/v6e: 128 MiB, v7x: 64 MiB)."""
    try:
        cap = int(pltpu.get_tpu_info().vmem_capacity_bytes)
    except Exception:
        cap = 64 << 20          # conservative: assume v7x if query unavailable
    return int(cap * 0.85)


def _pick_spatial_tile(S, C, itemsize, tile_budget_bytes):
    """Largest divisor of S that is a multiple of 128 lanes and fits the
    per-buffer byte budget (big tiles amortize the ~0.35us/step overhead)."""
    if S % 128 != 0:
        # TODO(synk): for very large non-128-divisible S this forces a whole-row
        # block; pad S in the wrapper if such configs ever appear.
        return S
    max_lanes = max(128, (tile_budget_bytes // max(C * itemsize, 1)) // 128 * 128)
    best, t, limit = 128, 128, min(S, max_lanes)
    while t <= limit:
        if S % t == 0:
            best = t
        t += 128
    return best


def _x_block_spec(C, TS, nbuf):
    """x input spec; optionally 3-deep buffered when tiles are small."""
    idx = lambda b, s: (b, 0, s)
    if nbuf > 2:
        try:
            return pl.BlockSpec((1, C, TS), idx, pipeline_mode=pl.Buffered(nbuf))
        except Exception:       # older jax without pipeline_mode: default 2-deep
            pass
    return pl.BlockSpec((1, C, TS), idx)


# ----------------------------------------------------------------------------
# In-kernel helpers
# ----------------------------------------------------------------------------
def _sigmoid(v):
    # exp (EUP) + approx reciprocal (EUP): keeps the once-per-batch epilogue off
    # the VALU divide path.
    return pl.reciprocal(1.0 + jnp.exp(-v), approx=True)


def _pool_tile(xt_f, wconv):
    """Per-tile partial pools: x sum, x max, conv(x) max (bias added later)."""
    d = jnp.dot(wconv, xt_f, preferred_element_type=jnp.float32)    # (NB, TS)
    return (jnp.sum(xt_f, axis=1, keepdims=True),                   # (C, 1)
            jnp.max(xt_f, axis=1, keepdims=True),                   # (C, 1)
            jnp.max(d, axis=1, keepdims=True))                      # (NB, 1)


def _attention_scale(S, NB, HID,
                     wconv, bconv, wa1t, ba1, wa2t, ba2,
                     wf1t, bf1, wf2t, bf2,
                     xsum, xmax, dmax):
    """SE attention math in column orientation; returns (C, 1) scale = att+1."""
    inv_s = 1.0 / float(S)
    xavg = xsum * inv_s                                              # (C, 1)
    zx = jnp.concatenate([xavg, xmax], axis=1)                       # (C, 2)

    # conv mean reconstructed from xsum (conv is linear); bias added post-pool
    # is exact for both mean and max.
    davg = jnp.dot(wconv, xavg, preferred_element_type=jnp.float32) + bconv
    zd = jnp.concatenate([davg, dmax + bconv], axis=1)               # (NB, 2)

    # domain branch: softmax(fc2(relu(fc1(.)))) for avg & max columns.
    h = jnp.maximum(jnp.dot(wf1t, zd, preferred_element_type=jnp.float32) + bf1,
                    0.0)                                             # (NB2, 2)
    logits = jnp.dot(wf2t, h, preferred_element_type=jnp.float32) + bf2
    logits = logits - jnp.max(logits, axis=0, keepdims=True)
    expl = jnp.exp(logits)
    sm = expl * pl.reciprocal(jnp.sum(expl, axis=0, keepdims=True), approx=True)
    w_dom = jnp.sum(sm, axis=1, keepdims=True)                       # (NB, 1)

    # adaptor MLPs: first Linear of every block batched into one dot; the tiny
    # per-block second Linear contributions are accumulated straight into the
    # (C, 1) pre-activation (no concat / lane relayout).
    ha = jnp.maximum(jnp.dot(wa1t, zx, preferred_element_type=jnp.float32) + ba1,
                     0.0)                                            # (NB*HID, 2)
    att_pre = jnp.zeros_like(xavg)                                   # (C, 1)
    for i in range(NB):
        hi = ha[i * HID:(i + 1) * HID, :]                            # (HID, 2)
        pre = (jnp.dot(wa2t[i], hi, preferred_element_type=jnp.float32)
               + ba2[i])                                             # (C, 2)
        contrib = jnp.sum(_sigmoid(pre), axis=1, keepdims=True)      # (C, 1)
        att_pre = att_pre + w_dom[i:i + 1, 0:1] * contrib

    return _sigmoid(att_pre) + 1.0          # out = x*att + x == x*(att+1)


# ----------------------------------------------------------------------------
# Kernels
# ----------------------------------------------------------------------------
def make_fused_kernel(S, TS, NS, NB, HID):
    """Streaming pooling + attention epilogue + in-place rescale of the
    VMEM-resident per-batch output slab."""
    def kernel(x_ref, wconv_ref, bconv_ref, wa1t_ref, ba1_ref, wa2t_ref,
               ba2_ref, wf1t_ref, bf1_ref, wf2t_ref, bf2_ref,
               o_ref, xsum_ref, xmax_ref, dmax_ref):
        s = pl.program_id(1)
        xt = x_ref[0]                                   # (C, TS), native dtype
        xt_f = xt.astype(jnp.float32)
        p_xsum, p_xmax, p_dmax = _pool_tile(xt_f, wconv_ref[...])

        def attention(xsum, xmax, dmax):
            return _attention_scale(
                S, NB, HID, wconv_ref[...], bconv_ref[...], wa1t_ref[...],
                ba1_ref[...], wa2t_ref[...], ba2_ref[...], wf1t_ref[...],
                bf1_ref[...], wf2t_ref[...], bf2_ref[...], xsum, xmax, dmax)

        if NS == 1:
            # Whole spatial extent in one tile: no staging round trip needed.
            scale = attention(p_xsum, p_xmax, p_dmax)
            o_ref[0] = (xt_f * scale).astype(o_ref.dtype)
            return

        @pl.when(s == 0)
        def _():
            xsum_ref[...] = p_xsum
            xmax_ref[...] = p_xmax
            dmax_ref[...] = p_dmax

        @pl.when(s != 0)
        def _():
            xsum_ref[...] = xsum_ref[...] + p_xsum
            xmax_ref[...] = jnp.maximum(xmax_ref[...], p_xmax)
            dmax_ref[...] = jnp.maximum(dmax_ref[...], p_dmax)

        # Stage the raw tile into the VMEM-resident per-batch output slab so x
        # is read from HBM exactly once; rescaled in place in the epilogue.
        # (On v5e, if vst slot saturates after adopting bf16 streaming, the
        # two-pass path below removes both VMEM store passes.)
        off = pl.multiple_of(s * TS, 128) if TS % 128 == 0 else s * TS
        o_ref[0, :, pl.ds(off, TS)] = xt

        @pl.when(s == NS - 1)
        def _():
            scale = attention(xsum_ref[...], xmax_ref[...], dmax_ref[...])
            o_ref[0] = (o_ref[0] * scale).astype(o_ref.dtype)

    return kernel


def make_pool_att_kernel(S, TS, NS, NB, HID):
    """Two-pass fallback, pass 1: streaming pooling -> per-channel scale."""
    def kernel(x_ref, wconv_ref, bconv_ref, wa1t_ref, ba1_ref, wa2t_ref,
               ba2_ref, wf1t_ref, bf1_ref, wf2t_ref, bf2_ref,
               scale_ref, xsum_ref, xmax_ref, dmax_ref):
        s = pl.program_id(1)
        xt_f = x_ref[0].astype(jnp.float32)
        p_xsum, p_xmax, p_dmax = _pool_tile(xt_f, wconv_ref[...])

        @pl.when(s == 0)
        def _():
            xsum_ref[...] = p_xsum
            xmax_ref[...] = p_xmax
            dmax_ref[...] = p_dmax

        @pl.when(s != 0)
        def _():
            xsum_ref[...] = xsum_ref[...] + p_xsum
            xmax_ref[...] = jnp.maximum(xmax_ref[...], p_xmax)
            dmax_ref[...] = jnp.maximum(dmax_ref[...], p_dmax)

        @pl.when(s == NS - 1)
        def _():
            scale_ref[0] = _attention_scale(
                S, NB, HID, wconv_ref[...], bconv_ref[...], wa1t_ref[...],
                ba1_ref[...], wa2t_ref[...], ba2_ref[...], wf1t_ref[...],
                bf1_ref[...], wf2t_ref[...], bf2_ref[...],
                xsum_ref[...], xmax_ref[...], dmax_ref[...])

    return kernel


def scale_kernel(x_ref, scale_ref, o_ref):
    """Two-pass fallback, pass 2: streaming rescale of x."""
    o_ref[0] = (x_ref[0].astype(jnp.float32) * scale_ref[0]).astype(o_ref.dtype)


# ----------------------------------------------------------------------------
# Wrapper
# ----------------------------------------------------------------------------
def adapt_se_block_forward(x, params, num_block, force_two_pass=False):
    B, C, H, W = x.shape
    S = H * W
    NB = num_block
    HID = params["wa1"].shape[2]
    NB2 = params["wf1"].shape[1]

    in_dtype = x.dtype
    itemsize = jnp.dtype(in_dtype).itemsize
    # Stream x in its native dtype (bf16 halves HBM bytes); upcast in-kernel.
    xs = x.reshape(B, C, S)

    f32 = jnp.float32
    # column-orientation weights (pre-transposed outside the kernel, tiny/cheap)
    wconv = params["w_conv"].astype(f32)                            # (NB, C)
    bconv = params["b_conv"].reshape(NB, 1).astype(f32)
    wa1t = params["wa1"].transpose(0, 2, 1).reshape(NB * HID, C).astype(f32)
    ba1c = params["ba1"].reshape(NB * HID, 1).astype(f32)
    wa2t = params["wa2"].transpose(0, 2, 1).astype(f32)             # (NB, C, HID)
    ba2c = params["ba2"][..., None].astype(f32)                     # (NB, C, 1)
    wf1t = params["wf1"].T.astype(f32)                              # (NB2, NB)
    bf1c = params["bf1"].reshape(NB2, 1).astype(f32)
    wf2t = params["wf2"].T.astype(f32)                              # (NB, NB2)
    bf2c = params["bf2"].reshape(NB, 1).astype(f32)
    weights = (wconv, bconv, wa1t, ba1c, wa2t, ba2c, wf1t, bf1c, wf2t, bf2c)
    weight_bytes = 4 * sum(int(np.prod(a.shape)) for a in weights)

    weight_specs = [
        pl.BlockSpec((NB, C), lambda b, s: (0, 0)),
        pl.BlockSpec((NB, 1), lambda b, s: (0, 0)),
        pl.BlockSpec((NB * HID, C), lambda b, s: (0, 0)),
        pl.BlockSpec((NB * HID, 1), lambda b, s: (0, 0)),
        pl.BlockSpec((NB, C, HID), lambda b, s: (0, 0, 0)),
        pl.BlockSpec((NB, C, 1), lambda b, s: (0, 0, 0)),
        pl.BlockSpec((NB2, NB), lambda b, s: (0, 0)),
        pl.BlockSpec((NB2, 1), lambda b, s: (0, 0)),
        pl.BlockSpec((NB, NB2), lambda b, s: (0, 0)),
        pl.BlockSpec((NB, 1), lambda b, s: (0, 0)),
    ]
    pool_scratch = [pltpu.VMEM((C, 1), f32),          # running x sum
                    pltpu.VMEM((C, 1), f32),          # running x max
                    pltpu.VMEM((NB, 1), f32)]         # running conv(x) max

    usable = _usable_vmem_bytes()
    slab_bytes = C * S * itemsize                     # per-batch output slab
    scratch_bytes = 4 * (3 * C + NB) + (1 << 12)
    headroom = 2 << 20

    # ---- preferred fused path: output slab resident in VMEM -----------------
    fused_fixed = 2 * slab_bytes + 2 * weight_bytes + scratch_bytes + headroom
    min_tile_bytes = 2 * C * min(128, S) * itemsize
    fused_ok = (not force_two_pass) and (fused_fixed + min_tile_bytes <= usable)

    if fused_ok:
        tile_budget = max((usable - fused_fixed) // 2, C * 128 * itemsize)
        TS = _pick_spatial_tile(S, C, itemsize, tile_budget)
        NS = S // TS
        nbuf = 3 if (TS < 512 and NS >= 4) else 2     # deeper pipe for small tiles

        est = nbuf * C * TS * itemsize + fused_fixed
        vmem_limit = int(min(max(est + est // 8, 16 << 20), usable))

        cost = pl.CostEstimate(
            flops=int(2 * B * NB * C * S + 2 * B * C * S),
            transcendentals=int(B * (2 * C * NB + C + 4 * NB)),
            bytes_accessed=int(2 * B * C * S * itemsize + weight_bytes))

        out = pl.pallas_call(
            make_fused_kernel(S, TS, NS, NB, HID),
            out_shape=jax.ShapeDtypeStruct((B, C, S), in_dtype),
            grid=(B, NS),
            in_specs=[_x_block_spec(C, TS, nbuf)] + weight_specs,
            out_specs=pl.BlockSpec((1, C, S), lambda b, s: (b, 0, 0)),
            scratch_shapes=pool_scratch,
            compiler_params=pltpu.CompilerParams(
                dimension_semantics=("parallel", "arbitrary"),
                vmem_limit_bytes=vmem_limit),
            cost_estimate=cost,
        )(xs, *weights)
        return out.reshape(B, C, H, W)

    # ---- two-pass fallback (slab does not fit VMEM, e.g. large C*S on v7x) --
    # Pass 1: streaming pooling -> (B, C, 1) scale.
    p1_budget = max((usable - 2 * weight_bytes - scratch_bytes - headroom) // 2,
                    C * 128 * itemsize)
    TS1 = _pick_spatial_tile(S, C, itemsize, p1_budget)
    NS1 = S // TS1
    nbuf1 = 3 if (TS1 < 512 and NS1 >= 4) else 2
    est1 = nbuf1 * C * TS1 * itemsize + 2 * weight_bytes + scratch_bytes + headroom
    vmem1 = int(min(max(est1 + est1 // 8, 16 << 20), usable))

    scale = pl.pallas_call(
        make_pool_att_kernel(S, TS1, NS1, NB, HID),
        out_shape=jax.ShapeDtypeStruct((B, C, 1), f32),
        grid=(B, NS1),
        in_specs=[_x_block_spec(C, TS1, nbuf1)] + weight_specs,
        out_specs=pl.BlockSpec((1, C, 1), lambda b, s: (b, 0, 0)),
        scratch_shapes=pool_scratch,
        compiler_params=pltpu.CompilerParams(
            dimension_semantics=("parallel", "arbitrary"),
            vmem_limit_bytes=vmem1),
        cost_estimate=pl.CostEstimate(
            flops=int(2 * B * NB * C * S),
            transcendentals=int(B * (2 * C * NB + C + 4 * NB)),
            bytes_accessed=int(B * C * S * itemsize + weight_bytes)),
    )(xs, *weights)

    # Pass 2: streaming rescale of x (extra HBM read of x, but fits 64 MiB).
    p2_budget = max((usable - headroom) // 4, C * 128 * itemsize)
    TS2 = _pick_spatial_tile(S, C, itemsize, p2_budget)
    NS2 = S // TS2
    est2 = 4 * C * TS2 * itemsize + headroom
    vmem2 = int(min(max(est2 + est2 // 8, 16 << 20), usable))

    out = pl.pallas_call(
        scale_kernel,
        out_shape=jax.ShapeDtypeStruct((B, C, S), in_dtype),
        grid=(B, NS2),
        in_specs=[pl.BlockSpec((1, C, TS2), lambda b, s: (b, 0, s)),
                  pl.BlockSpec((1, C, 1), lambda b, s: (b, 0, 0))],
        out_specs=pl.BlockSpec((1, C, TS2), lambda b, s: (b, 0, s)),
        compiler_params=pltpu.CompilerParams(
            dimension_semantics=("parallel", "parallel"),
            vmem_limit_bytes=vmem2),
        cost_estimate=pl.CostEstimate(
            flops=int(2 * B * C * S), transcendentals=0,
            bytes_accessed=int(2 * B * C * S * itemsize + B * C * 4)),
    )(xs, scale)
    return out.reshape(B, C, H, W)


# ----------------------------------------------------------------------------
# Pure-JAX reference (faithful to the PyTorch forward) for verification.
# ----------------------------------------------------------------------------
def reference_forward(x, p, num_block):
    B, C, H, W = x.shape
    S = H * W
    xs = x.reshape(B, C, S).astype(jnp.float32)
    out_avg = xs.mean(axis=2)                                   # (B, C)
    out_max = xs.max(axis=2)                                    # (B, C)

    d = jnp.einsum("nc,bcs->bns", p["w_conv"], xs) + p["b_conv"][None, :, None]
    d_avg = d.mean(axis=2)                                      # (B, NB)
    d_max = d.max(axis=2)

    recal = []
    for i in range(num_block):
        def mlp(z, i=i):
            h = jnp.maximum(z @ p["wa1"][i] + p["ba1"][i], 0.0)
            return jax.nn.sigmoid(h @ p["wa2"][i] + p["ba2"][i])
        recal.append(mlp(out_avg) + mlp(out_max))
    recal = jnp.stack(recal, axis=1)                            # (B, NB, C)

    def dom(z):
        h = jnp.maximum(z @ p["wf1"] + p["bf1"], 0.0)
        return jax.nn.softmax(h @ p["wf2"] + p["bf2"], axis=1)

    w_dom = dom(d_avg) + dom(d_max)                             # (B, NB)
    dr = jnp.einsum("bnc,bn->bc", recal, w_dom)                 # (B, C)
    att = jax.nn.sigmoid(dr)
    return xs.reshape(B, C, H, W) * att[:, :, None, None] + xs.reshape(B, C, H, W)


# ----------------------------------------------------------------------------
# Deterministic parameter init (shapes from Adapt_SE_block.__init__)
# ----------------------------------------------------------------------------
def init_params(key, planes, num_block, shrink):
    hidden = planes // shrink
    nb2 = round(num_block / 2)
    ks = jax.random.split(key, 10)

    def w(k, shape, scale=0.1):
        return (scale * jax.random.normal(k, shape)).astype(jnp.float32)

    return dict(
        w_conv=w(ks[0], (num_block, planes)),          # 1x1 conv weight
        b_conv=w(ks[1], (num_block,)),
        wa1=w(ks[2], (num_block, planes, hidden)),     # adaptor Linear1 (stacked)
        ba1=w(ks[3], (num_block, hidden)),
        wa2=w(ks[4], (num_block, hidden, planes)),     # adaptor Linear2 (stacked)
        ba2=w(ks[5], (num_block, planes)),
        wf1=w(ks[6], (num_block, nb2)),                # fc1
        bf1=w(ks[7], (1, nb2)),
        wf2=w(ks[8], (nb2, num_block)),                # fc2
        bf2=w(ks[9], (1, num_block)),
    )


if __name__ == "__main__":
    key = jax.random.PRNGKey(0)
    kx, kp = jax.random.split(key)

    B, planes, H, W = 2, 16, 16, 16       # small spatial (global pool semantics)
    num_block, shrink = 4, 4

    x = jax.random.normal(kx, (B, planes, H, W), dtype=jnp.float32)
    params = init_params(kp, planes, num_block, shrink)
    ref = reference_forward(x, params, num_block)

    fwd = jax.jit(adapt_se_block_forward, static_argnums=(2, 3))

    # fused (slab-resident) path
    out = jax.block_until_ready(fwd(x, params, num_block, False))
    np.testing.assert_allclose(np.asarray(out), np.asarray(ref),
                               rtol=5e-3, atol=5e-3)
    assert out.shape == x.shape and out.dtype == x.dtype

    # two-pass fallback path (used when the output slab would not fit VMEM)
    out2 = jax.block_until_ready(fwd(x, params, num_block, True))
    np.testing.assert_allclose(np.asarray(out2), np.asarray(ref),
                               rtol=5e-3, atol=5e-3)

    print("KERNEL_OK")
</pallas_src>

<mosaic_0001>
module attributes {stable_mosaic.version = 11 : i64} {
  func.func @kernel(%arg0: i32, %arg1: i32, %arg2: memref<1x16x256xf32, #tpu.memory_space<vmem>>, %arg3: memref<4x16xf32, #tpu.memory_space<vmem>>, %arg4: memref<4x1xf32, #tpu.memory_space<vmem>>, %arg5: memref<16x16xf32, #tpu.memory_space<vmem>>, %arg6: memref<16x1xf32, #tpu.memory_space<vmem>>, %arg7: memref<4x16x4xf32, #tpu.memory_space<vmem>>, %arg8: memref<4x16x1xf32, #tpu.memory_space<vmem>>, %arg9: memref<2x4xf32, #tpu.memory_space<vmem>>, %arg10: memref<2x1xf32, #tpu.memory_space<vmem>>, %arg11: memref<4x2xf32, #tpu.memory_space<vmem>>, %arg12: memref<4x1xf32, #tpu.memory_space<vmem>>, %arg13: memref<1x16x256xf32, #tpu.memory_space<vmem>>, %arg14: memref<16x1xf32, #tpu.memory_space<vmem>>, %arg15: memref<16x1xf32, #tpu.memory_space<vmem>>, %arg16: memref<4x1xf32, #tpu.memory_space<vmem>>) attributes {dimension_semantics = [#tpu.dimension_semantics<parallel>, #tpu.dimension_semantics<arbitrary>], iteration_bounds = array<i64: 2, 1>, scalar_prefetch = 0 : i64, scratch_operands = 3 : i64, tpu.core_type = #tpu.core_type<tc>, window_params = [{transform_indices = @transform_0, window_bounds = array<i64: 1, 16, 256>}, {pipeline_mode = #tpu.pipeline_mode<synchronous>, transform_indices = @transform_1, window_bounds = array<i64: 4, 16>}, {pipeline_mode = #tpu.pipeline_mode<synchronous>, transform_indices = @transform_2, window_bounds = array<i64: 4, 1>}, {pipeline_mode = #tpu.pipeline_mode<synchronous>, transform_indices = @transform_3, window_bounds = array<i64: 16, 16>}, {pipeline_mode = #tpu.pipeline_mode<synchronous>, transform_indices = @transform_4, window_bounds = array<i64: 16, 1>}, {pipeline_mode = #tpu.pipeline_mode<synchronous>, transform_indices = @transform_5, window_bounds = array<i64: 4, 16, 4>}, {pipeline_mode = #tpu.pipeline_mode<synchronous>, transform_indices = @transform_6, window_bounds = array<i64: 4, 16, 1>}, {pipeline_mode = #tpu.pipeline_mode<synchronous>, transform_indices = @transform_7, window_bounds = array<i64: 2, 4>}, {pipeline_mode = #tpu.pipeline_mode<synchronous>, transform_indices = @transform_8, window_bounds = array<i64: 2, 1>}, {pipeline_mode = #tpu.pipeline_mode<synchronous>, transform_indices = @transform_9, window_bounds = array<i64: 4, 2>}, {pipeline_mode = #tpu.pipeline_mode<synchronous>, transform_indices = @transform_10, window_bounds = array<i64: 4, 1>}, {transform_indices = @transform_11, window_bounds = array<i64: 1, 16, 256>}]} {
    %c0 = arith.constant 0 : index
    %c0_0 = arith.constant 0 : index
    %c0_1 = arith.constant 0 : index
    %0 = vector.load %arg2[%c0, %c0_0, %c0_1] : memref<1x16x256xf32, #tpu.memory_space<vmem>>, vector<1x16x256xf32>
    %1 = vector.shape_cast %0 : vector<1x16x256xf32> to vector<16x256xf32>
    %c0_2 = arith.constant 0 : index
    %c0_3 = arith.constant 0 : index
    %2 = vector.load %arg3[%c0_2, %c0_3] : memref<4x16xf32, #tpu.memory_space<vmem>>, vector<4x16xf32>
    %cst = arith.constant dense<0.000000e+00> : vector<4x256xf32>
    %3 = tpu.matmul %2, %1, %cst {dimension_numbers = #tpu.dot_dimension_numbers<[1], [0], [0], [1], [0, 0, 1, 1], [], []>} : vector<4x16xf32>, vector<16x256xf32>, vector<4x256xf32> -> vector<4x256xf32>
    %cst_4 = arith.constant dense<0.000000e+00> : vector<16xf32>
    %4 = vector.multi_reduction <add>, %1, %cst_4 [1] : vector<16x256xf32> to vector<16xf32>
    %5 = vector.shape_cast %4 : vector<16xf32> to vector<16x1xf32>
    %cst_5 = arith.constant dense<0xFF800000> : vector<16xf32>
    %6 = vector.multi_reduction <maximumf>, %1, %cst_5 [1] : vector<16x256xf32> to vector<16xf32>
    %7 = vector.shape_cast %6 : vector<16xf32> to vector<16x1xf32>
    %cst_6 = arith.constant dense<0xFF800000> : vector<4xf32>
    %8 = vector.multi_reduction <maximumf>, %3, %cst_6 [1] : vector<4x256xf32> to vector<4xf32>
    %9 = vector.shape_cast %8 : vector<4xf32> to vector<4x1xf32>
    %c0_7 = arith.constant 0 : index
    %c0_8 = arith.constant 0 : index
    %10 = vector.load %arg3[%c0_7, %c0_8] : memref<4x16xf32, #tpu.memory_space<vmem>>, vector<4x16xf32>
    %c0_9 = arith.constant 0 : index
    %c0_10 = arith.constant 0 : index
    %11 = vector.load %arg4[%c0_9, %c0_10] : memref<4x1xf32, #tpu.memory_space<vmem>>, vector<4x1xf32>
    %c0_11 = arith.constant 0 : index
    %c0_12 = arith.constant 0 : index
    %12 = vector.load %arg5[%c0_11, %c0_12] : memref<16x16xf32, #tpu.memory_space<vmem>>, vector<16x16xf32>
    %c0_13 = arith.constant 0 : index
    %c0_14 = arith.constant 0 : index
    %13 = vector.load %arg6[%c0_13, %c0_14] : memref<16x1xf32, #tpu.memory_space<vmem>>, vector<16x1xf32>
    %c0_15 = arith.constant 0 : index
    %c0_16 = arith.constant 0 : index
    %c0_17 = arith.constant 0 : index
    %14 = vector.load %arg7[%c0_15, %c0_16, %c0_17] : memref<4x16x4xf32, #tpu.memory_space<vmem>>, vector<4x16x4xf32>
    %c0_18 = arith.constant 0 : index
    %c0_19 = arith.constant 0 : index
    %c0_20 = arith.constant 0 : index
    %15 = vector.load %arg8[%c0_18, %c0_19, %c0_20] : memref<4x16x1xf32, #tpu.memory_space<vmem>>, vector<4x16x1xf32>
    %c0_21 = arith.constant 0 : index
    %c0_22 = arith.constant 0 : index
    %16 = vector.load %arg9[%c0_21, %c0_22] : memref<2x4xf32, #tpu.memory_space<vmem>>, vector<2x4xf32>
    %c0_23 = arith.constant 0 : index
    %c0_24 = arith.constant 0 : index
    %17 = vector.load %arg10[%c0_23, %c0_24] : memref<2x1xf32, #tpu.memory_space<vmem>>, vector<2x1xf32>
    %c0_25 = arith.constant 0 : index
    %c0_26 = arith.constant 0 : index
    %18 = vector.load %arg11[%c0_25, %c0_26] : memref<4x2xf32, #tpu.memory_space<vmem>>, vector<4x2xf32>
    %c0_27 = arith.constant 0 : index
    %c0_28 = arith.constant 0 : index
    %19 = vector.load %arg12[%c0_27, %c0_28] : memref<4x1xf32, #tpu.memory_space<vmem>>, vector<4x1xf32>
    %cst_29 = arith.constant 3.906250e-03 : f32
    %20 = vector.broadcast %cst_29 : f32 to vector<16x1xf32>
    %21 = arith.mulf %5, %20 : vector<16x1xf32>
    %22 = tpu.concatenate %21, %7 in 1 : vector<16x1xf32>, vector<16x1xf32> -> vector<16x2xf32>
    %cst_30 = arith.constant dense<0.000000e+00> : vector<4x1xf32>
    %23 = tpu.matmul %10, %21, %cst_30 {dimension_numbers = #tpu.dot_dimension_numbers<[1], [0], [0], [1], [0, 0, 1, 1], [], []>} : vector<4x16xf32>, vector<16x1xf32>, vector<4x1xf32> -> vector<4x1xf32>
    %24 = arith.addf %23, %11 : vector<4x1xf32>
    %25 = arith.addf %9, %11 : vector<4x1xf32>
    %26 = tpu.concatenate %24, %25 in 1 : vector<4x1xf32>, vector<4x1xf32> -> vector<4x2xf32>
    %cst_31 = arith.constant dense<0.000000e+00> : vector<2x2xf32>
    %27 = tpu.matmul %16, %26, %cst_31 {dimension_numbers = #tpu.dot_dimension_numbers<[1], [0], [0], [1], [0, 0, 1, 1], [], []>} : vector<2x4xf32>, vector<4x2xf32>, vector<2x2xf32> -> vector<2x2xf32>
    %28 = vector.broadcast %17 : vector<2x1xf32> to vector<2x2xf32>
    %29 = arith.addf %27, %28 : vector<2x2xf32>
    %cst_32 = arith.constant 0.000000e+00 : f32
    %30 = vector.broadcast %cst_32 : f32 to vector<2x2xf32>
    %31 = arith.maximumf %29, %30 : vector<2x2xf32>
    %cst_33 = arith.constant dense<0.000000e+00> : vector<4x2xf32>
    %32 = tpu.matmul %18, %31, %cst_33 {dimension_numbers = #tpu.dot_dimension_numbers<[1], [0], [0], [1], [0, 0, 1, 1], [], []>} : vector<4x2xf32>, vector<2x2xf32>, vector<4x2xf32> -> vector<4x2xf32>
    %33 = vector.broadcast %19 : vector<4x1xf32> to vector<4x2xf32>
    %34 = arith.addf %32, %33 : vector<4x2xf32>
    %cst_34 = arith.constant dense<0xFF800000> : vector<2xf32>
    %35 = vector.multi_reduction <maximumf>, %34, %cst_34 [0] : vector<4x2xf32> to vector<2xf32>
    %36 = vector.shape_cast %35 : vector<2xf32> to vector<1x2xf32>
    %37 = vector.broadcast %36 : vector<1x2xf32> to vector<4x2xf32>
    %38 = arith.subf %34, %37 : vector<4x2xf32>
    %39 = math.exp %38 : vector<4x2xf32>
    %cst_35 = arith.constant dense<0.000000e+00> : vector<2xf32>
    %40 = vector.multi_reduction <add>, %39, %cst_35 [0] : vector<4x2xf32> to vector<2xf32>
    %41 = vector.shape_cast %40 : vector<2xf32> to vector<1x2xf32>
    %42 = tpu.reciprocal %41 {approx = true} : vector<1x2xf32> -> vector<1x2xf32>
    %43 = vector.broadcast %42 : vector<1x2xf32> to vector<4x2xf32>
    %44 = arith.mulf %39, %43 : vector<4x2xf32>
    %cst_36 = arith.constant dense<0.000000e+00> : vector<4xf32>
    %45 = vector.multi_reduction <add>, %44, %cst_36 [1] : vector<4x2xf32> to vector<4xf32>
    %46 = vector.shape_cast %45 : vector<4xf32> to vector<4x1xf32>
    %cst_37 = arith.constant dense<0.000000e+00> : vector<16x2xf32>
    %47 = tpu.matmul %12, %22, %cst_37 {dimension_numbers = #tpu.dot_dimension_numbers<[1], [0], [0], [1], [0, 0, 1, 1], [], []>} : vector<16x16xf32>, vector<16x2xf32>, vector<16x2xf32> -> vector<16x2xf32>
    %48 = vector.broadcast %13 : vector<16x1xf32> to vector<16x2xf32>
    %49 = arith.addf %47, %48 : vector<16x2xf32>
    %cst_38 = arith.constant 0.000000e+00 : f32
    %50 = vector.broadcast %cst_38 : f32 to vector<16x2xf32>
    %51 = arith.maximumf %49, %50 : vector<16x2xf32>
    %cst_39 = arith.constant 0.000000e+00 : f32
    %52 = vector.broadcast %cst_39 : f32 to vector<16x1xf32>
    %53 = vector.extract_strided_slice %51 {offsets = [0, 0], sizes = [4, 2], strides = [1, 1]} : vector<16x2xf32> to vector<4x2xf32>
    %54 = vector.extract_strided_slice %14 {offsets = [0, 0, 0], sizes = [1, 16, 4], strides = [1, 1, 1]} : vector<4x16x4xf32> to vector<1x16x4xf32>
    %55 = vector.shape_cast %54 : vector<1x16x4xf32> to vector<16x4xf32>
    %cst_40 = arith.constant dense<0.000000e+00> : vector<16x2xf32>
    %56 = tpu.matmul %55, %53, %cst_40 {dimension_numbers = #tpu.dot_dimension_numbers<[1], [0], [0], [1], [0, 0, 1, 1], [], []>} : vector<16x4xf32>, vector<4x2xf32>, vector<16x2xf32> -> vector<16x2xf32>
    %57 = vector.extract_strided_slice %15 {offsets = [0, 0, 0], sizes = [1, 16, 1], strides = [1, 1, 1]} : vector<4x16x1xf32> to vector<1x16x1xf32>
    %58 = vector.shape_cast %57 : vector<1x16x1xf32> to vector<16x1xf32>
    %59 = vector.broadcast %58 : vector<16x1xf32> to vector<16x2xf32>
    %60 = arith.addf %56, %59 : vector<16x2xf32>
    %cst_41 = arith.constant 0.000000e+00 : f32
    %61 = vector.broadcast %cst_41 : f32 to vector<16x2xf32>
    %62 = arith.subf %61, %60 : vector<16x2xf32>
    %63 = math.exp %62 : vector<16x2xf32>
    %cst_42 = arith.constant 1.000000e+00 : f32
    %64 = vector.broadcast %cst_42 : f32 to vector<16x2xf32>
    %65 = arith.addf %64, %63 : vector<16x2xf32>
    %66 = tpu.reciprocal %65 {approx = true} : vector<16x2xf32> -> vector<16x2xf32>
    %cst_43 = arith.constant dense<0.000000e+00> : vector<16xf32>
    %67 = vector.multi_reduction <add>, %66, %cst_43 [1] : vector<16x2xf32> to vector<16xf32>
    %68 = vector.shape_cast %67 : vector<16xf32> to vector<16x1xf32>
    %69 = vector.extract_strided_slice %46 {offsets = [0, 0], sizes = [1, 1], strides = [1, 1]} : vector<4x1xf32> to vector<1x1xf32>
    %70 = vector.broadcast %69 : vector<1x1xf32> to vector<16x1xf32>
    %71 = arith.mulf %70, %68 : vector<16x1xf32>
    %72 = arith.addf %52, %71 : vector<16x1xf32>
    %73 = vector.extract_strided_slice %51 {offsets = [4, 0], sizes = [4, 2], strides = [1, 1]} : vector<16x2xf32> to vector<4x2xf32>
    %74 = vector.extract_strided_slice %14 {offsets = [1, 0, 0], sizes = [1, 16, 4], strides = [1, 1, 1]} : vector<4x16x4xf32> to vector<1x16x4xf32>
    %75 = vector.shape_cast %74 : vector<1x16x4xf32> to vector<16x4xf32>
    %cst_44 = arith.constant dense<0.000000e+00> : vector<16x2xf32>
    %76 = tpu.matmul %75, %73, %cst_44 {dimension_numbers = #tpu.dot_dimension_numbers<[1], [0], [0], [1], [0, 0, 1, 1], [], []>} : vector<16x4xf32>, vector<4x2xf32>, vector<16x2xf32> -> vector<16x2xf32>
    %77 = vector.extract_strided_slice %15 {offsets = [1, 0, 0], sizes = [1, 16, 1], strides = [1, 1, 1]} : vector<4x16x1xf32> to vector<1x16x1xf32>
    %78 = vector.shape_cast %77 : vector<1x16x1xf32> to vector<16x1xf32>
    %79 = vector.broadcast %78 : vector<16x1xf32> to vector<16x2xf32>
    %80 = arith.addf %76, %79 : vector<16x2xf32>
    %cst_45 = arith.constant 0.000000e+00 : f32
    %81 = vector.broadcast %cst_45 : f32 to vector<16x2xf32>
    %82 = arith.subf %81, %80 : vector<16x2xf32>
    %83 = math.exp %82 : vector<16x2xf32>
    %cst_46 = arith.constant 1.000000e+00 : f32
    %84 = vector.broadcast %cst_46 : f32 to vector<16x2xf32>
    %85 = arith.addf %84, %83 : vector<16x2xf32>
    %86 = tpu.reciprocal %85 {approx = true} : vector<16x2xf32> -> vector<16x2xf32>
    %cst_47 = arith.constant dense<0.000000e+00> : vector<16xf32>
    %87 = vector.multi_reduction <add>, %86, %cst_47 [1] : vector<16x2xf32> to vector<16xf32>
    %88 = vector.shape_cast %87 : vector<16xf32> to vector<16x1xf32>
    %89 = vector.extract_strided_slice %46 {offsets = [1, 0], sizes = [1, 1], strides = [1, 1]} : vector<4x1xf32> to vector<1x1xf32>
    %90 = vector.broadcast %89 : vector<1x1xf32> to vector<16x1xf32>
    %91 = arith.mulf %90, %88 : vector<16x1xf32>
    %92 = arith.addf %72, %91 : vector<16x1xf32>
    %93 = vector.extract_strided_slice %51 {offsets = [8, 0], sizes = [4, 2], strides = [1, 1]} : vector<16x2xf32> to vector<4x2xf32>
    %94 = vector.extract_strided_slice %14 {offsets = [2, 0, 0], sizes = [1, 16, 4], strides = [1, 1, 1]} : vector<4x16x4xf32> to vector<1x16x4xf32>
    %95 = vector.shape_cast %94 : vector<1x16x4xf32> to vector<16x4xf32>
    %cst_48 = arith.constant dense<0.000000e+00> : vector<16x2xf32>
    %96 = tpu.matmul %95, %93, %cst_48 {dimension_numbers = #tpu.dot_dimension_numbers<[1], [0], [0], [1], [0, 0, 1, 1], [], []>} : vector<16x4xf32>, vector<4x2xf32>, vector<16x2xf32> -> vector<16x2xf32>
    %97 = vector.extract_strided_slice %15 {offsets = [2, 0, 0], sizes = [1, 16, 1], strides = [1, 1, 1]} : vector<4x16x1xf32> to vector<1x16x1xf32>
    %98 = vector.shape_cast %97 : vector<1x16x1xf32> to vector<16x1xf32>
    %99 = vector.broadcast %98 : vector<16x1xf32> to vector<16x2xf32>
    %100 = arith.addf %96, %99 : vector<16x2xf32>
    %cst_49 = arith.constant 0.000000e+00 : f32
    %101 = vector.broadcast %cst_49 : f32 to vector<16x2xf32>
    %102 = arith.subf %101, %100 : vector<16x2xf32>
    %103 = math.exp %102 : vector<16x2xf32>
    %cst_50 = arith.constant 1.000000e+00 : f32
    %104 = vector.broadcast %cst_50 : f32 to vector<16x2xf32>
    %105 = arith.addf %104, %103 : vector<16x2xf32>
    %106 = tpu.reciprocal %105 {approx = true} : vector<16x2xf32> -> vector<16x2xf32>
    %cst_51 = arith.constant dense<0.000000e+00> : vector<16xf32>
    %107 = vector.multi_reduction <add>, %106, %cst_51 [1] : vector<16x2xf32> to vector<16xf32>
    %108 = vector.shape_cast %107 : vector<16xf32> to vector<16x1xf32>
    %109 = vector.extract_strided_slice %46 {offsets = [2, 0], sizes = [1, 1], strides = [1, 1]} : vector<4x1xf32> to vector<1x1xf32>
    %110 = vector.broadcast %109 : vector<1x1xf32> to vector<16x1xf32>
    %111 = arith.mulf %110, %108 : vector<16x1xf32>
    %112 = arith.addf %92, %111 : vector<16x1xf32>
    %113 = vector.extract_strided_slice %51 {offsets = [12, 0], sizes = [4, 2], strides = [1, 1]} : vector<16x2xf32> to vector<4x2xf32>
    %114 = vector.extract_strided_slice %14 {offsets = [3, 0, 0], sizes = [1, 16, 4], strides = [1, 1, 1]} : vector<4x16x4xf32> to vector<1x16x4xf32>
    %115 = vector.shape_cast %114 : vector<1x16x4xf32> to vector<16x4xf32>
    %cst_52 = arith.constant dense<0.000000e+00> : vector<16x2xf32>
    %116 = tpu.matmul %115, %113, %cst_52 {dimension_numbers = #tpu.dot_dimension_numbers<[1], [0], [0], [1], [0, 0, 1, 1], [], []>} : vector<16x4xf32>, vector<4x2xf32>, vector<16x2xf32> -> vector<16x2xf32>
    %117 = vector.extract_strided_slice %15 {offsets = [3, 0, 0], sizes = [1, 16, 1], strides = [1, 1, 1]} : vector<4x16x1xf32> to vector<1x16x1xf32>
    %118 = vector.shape_cast %117 : vector<1x16x1xf32> to vector<16x1xf32>
    %119 = vector.broadcast %118 : vector<16x1xf32> to vector<16x2xf32>
    %120 = arith.addf %116, %119 : vector<16x2xf32>
    %cst_53 = arith.constant 0.000000e+00 : f32
    %121 = vector.broadcast %cst_53 : f32 to vector<16x2xf32>
    %122 = arith.subf %121, %120 : vector<16x2xf32>
    %123 = math.exp %122 : vector<16x2xf32>
    %cst_54 = arith.constant 1.000000e+00 : f32
    %124 = vector.broadcast %cst_54 : f32 to vector<16x2xf32>
    %125 = arith.addf %124, %123 : vector<16x2xf32>
    %126 = tpu.reciprocal %125 {approx = true} : vector<16x2xf32> -> vector<16x2xf32>
    %cst_55 = arith.constant dense<0.000000e+00> : vector<16xf32>
    %127 = vector.multi_reduction <add>, %126, %cst_55 [1] : vector<16x2xf32> to vector<16xf32>
    %128 = vector.shape_cast %127 : vector<16xf32> to vector<16x1xf32>
    %129 = vector.extract_strided_slice %46 {offsets = [3, 0], sizes = [1, 1], strides = [1, 1]} : vector<4x1xf32> to vector<1x1xf32>
    %130 = vector.broadcast %129 : vector<1x1xf32> to vector<16x1xf32>
    %131 = arith.mulf %130, %128 : vector<16x1xf32>
    %132 = arith.addf %112, %131 : vector<16x1xf32>
    %cst_56 = arith.constant 0.000000e+00 : f32
    %133 = vector.broadcast %cst_56 : f32 to vector<16x1xf32>
    %134 = arith.subf %133, %132 : vector<16x1xf32>
    %135 = math.exp %134 : vector<16x1xf32>
    %cst_57 = arith.constant 1.000000e+00 : f32
    %136 = vector.broadcast %cst_57 : f32 to vector<16x1xf32>
    %137 = arith.addf %136, %135 : vector<16x1xf32>
    %138 = tpu.reciprocal %137 {approx = true} : vector<16x1xf32> -> vector<16x1xf32>
    %cst_58 = arith.constant 1.000000e+00 : f32
    %139 = vector.broadcast %cst_58 : f32 to vector<16x1xf32>
    %140 = arith.addf %138, %139 : vector<16x1xf32>
    %141 = vector.broadcast %140 : vector<16x1xf32> to vector<16x256xf32>
    %142 = arith.mulf %1, %141 : vector<16x256xf32>
    %c0_59 = arith.constant 0 : index
    %c0_60 = arith.constant 0 : index
    %c0_61 = arith.constant 0 : index
    %143 = vector.load %arg13[%c0_59, %c0_60, %c0_61] : memref<1x16x256xf32, #tpu.memory_space<vmem>>, vector<1x16x256xf32>
    %144 = vector.shape_cast %143 : vector<1x16x256xf32> to vector<16x256xf32>
    %145 = vector.shape_cast %142 : vector<16x256xf32> to vector<1x16x256xf32>
    tpu.vector_store %arg13[%c0_59, %c0_60, %c0_61], %145 {strides = array<i32>} : memref<1x16x256xf32, #tpu.memory_space<vmem>>, vector<1x16x256xf32>,
    return
  }
  func.func @transform_0(%arg0: i32, %arg1: i32) -> (i32, i32, i32) {
    %c0_i32 = arith.constant 0 : i32
    %c0_i32_0 = arith.constant 0 : i32
    return %arg0, %c0_i32, %arg1 : i32, i32, i32
  }
  func.func @transform_1(%arg0: i32, %arg1: i32) -> (i32, i32) {
    %c0_i32 = arith.constant 0 : i32
    %c0_i32_0 = arith.constant 0 : i32
    %c0_i32_1 = arith.constant 0 : i32
    return %c0_i32, %c0_i32_0 : i32, i32
  }
  func.func @transform_2(%arg0: i32, %arg1: i32) -> (i32, i32) {
    %c0_i32 = arith.constant 0 : i32
    %c0_i32_0 = arith.constant 0 : i32
    %c0_i32_1 = arith.constant 0 : i32
    return %c0_i32, %c0_i32_0 : i32, i32
  }
  func.func @transform_3(%arg0: i32, %arg1: i32) -> (i32, i32) {
    %c0_i32 = arith.constant 0 : i32
    %c0_i32_0 = arith.constant 0 : i32
    %c0_i32_1 = arith.constant 0 : i32
    return %c0_i32, %c0_i32_0 : i32, i32
  }
  func.func @transform_4(%arg0: i32, %arg1: i32) -> (i32, i32) {
    %c0_i32 = arith.constant 0 : i32
    %c0_i32_0 = arith.constant 0 : i32
    %c0_i32_1 = arith.constant 0 : i32
    return %c0_i32, %c0_i32_0 : i32, i32
  }
  func.func @transform_5(%arg0: i32, %arg1: i32) -> (i32, i32, i32) {
    %c0_i32 = arith.constant 0 : i32
    %c0_i32_0 = arith.constant 0 : i32
    %c0_i32_1 = arith.constant 0 : i32
    %c0_i32_2 = arith.constant 0 : i32
    return %c0_i32, %c0_i32_0, %c0_i32_1 : i32, i32, i32
  }
  func.func @transform_6(%arg0: i32, %arg1: i32) -> (i32, i32, i32) {
    %c0_i32 = arith.constant 0 : i32
    %c0_i32_0 = arith.constant 0 : i32
    %c0_i32_1 = arith.constant 0 : i32
    %c0_i32_2 = arith.constant 0 : i32
    return %c0_i32, %c0_i32_0, %c0_i32_1 : i32, i32, i32
  }
  func.func @transform_7(%arg0: i32, %arg1: i32) -> (i32, i32) {
    %c0_i32 = arith.constant 0 : i32
    %c0_i32_0 = arith.constant 0 : i32
    %c0_i32_1 = arith.constant 0 : i32
    return %c0_i32, %c0_i32_0 : i32, i32
  }
  func.func @transform_8(%arg0: i32, %arg1: i32) -> (i32, i32) {
    %c0_i32 = arith.constant 0 : i32
    %c0_i32_0 = arith.constant 0 : i32
    %c0_i32_1 = arith.constant 0 : i32
    return %c0_i32, %c0_i32_0 : i32, i32
  }
  func.func @transform_9(%arg0: i32, %arg1: i32) -> (i32, i32) {
    %c0_i32 = arith.constant 0 : i32
    %c0_i32_0 = arith.constant 0 : i32
    %c0_i32_1 = arith.constant 0 : i32
    return %c0_i32, %c0_i32_0 : i32, i32
  }
  func.func @transform_10(%arg0: i32, %arg1: i32) -> (i32, i32) {
    %c0_i32 = arith.constant 0 : i32
    %c0_i32_0 = arith.constant 0 : i32
    %c0_i32_1 = arith.constant 0 : i32
    return %c0_i32, %c0_i32_0 : i32, i32
  }
  func.func @transform_11(%arg0: i32, %arg1: i32) -> (i32, i32, i32) {
    %c0_i32 = arith.constant 0 : i32
    %c0_i32_0 = arith.constant 0 : i32
    %c0_i32_1 = arith.constant 0 : i32
    return %arg0, %c0_i32, %c0_i32_0 : i32, i32, i32
  }
}

</mosaic_0001>

<bundles_post_ra>
// kernel: adapt_se_block_forward.1
= control target key start
LH: loop header
LB: loop body
LE: loop exit
PB: predicated region body
PF: predicated region fallthrough
CT: control target
= control target key end

     0   :  { %s1737_s17 = smov 0   ;;  %s1739_s18 = smov 0   ;;  %s1921_s0 = inlined_call_operand.vmem [shape: f32[2,16,256], index: 0, kind: input, shape index: {}]   ;;  %s1922_s1 = inlined_call_operand.vmem [shape: f32[4,16], index: 1, kind: input, shape index: {}]   ;;  %s1923_s2 = inlined_call_operand.vmem [shape: f32[4,1], index: 2, kind: input, shape index: {}]   ;;  %s1924_s3 = inlined_call_operand.vmem [shape: f32[16,16], index: 3, kind: input, shape index: {}]   ;;  %s1925_s4 = inlined_call_operand.vmem [shape: f32[16,1], index: 4, kind: input, shape index: {}]   ;;  %s1926_s5 = inlined_call_operand.vmem [shape: f32[4,16,4], index: 5, kind: input, shape index: {}]   ;;  %s1927_s6 = inlined_call_operand.vmem [shape: f32[4,16,1], index: 6, kind: input, shape index: {}]   ;;  %s1928_s7 = inlined_call_operand.vmem [shape: f32[2,4], index: 7, kind: input, shape index: {}]   ;;  %s1929_s8 = inlined_call_operand.vmem [shape: f32[2,1], index: 8, kind: input, shape index: {}]   ;;  %s1930_s9 = inlined_call_operand.vmem [shape: f32[4,2], index: 9, kind: input, shape index: {}]   ;;  %s1931_s10 = inlined_call_operand.vmem [shape: f32[4,1], index: 10, kind: input, shape index: {}]   ;;  %s1932_s11 = inlined_call_operand.vmem [shape: f32[2,16,256], index: 11, kind: output, shape index: {}]  }
   0x1   :  { %s1741_s19 = smov 0  }
   0x2 LB: > { %s33_s20 = sadd.s32 1, %s1666_s18  ;;  %p1466_p0 = scmp.ge.s32.totalorder %s1670_s19, 1  ;;  %s1670_s19 = sphi %s1741_s19, %s21_s19   ;;  %s1666_s18 = sphi %s1739_s18, %s1934_s18   ;;  %s1662_s17 = sphi %s1737_s17, %s1933_s17  }
   0x3   : > { %p35_p1 = scmp.ge.s32.totalorder %s33_s20, 2  ;;  %p356_p2 = scmp.lt.s32.totalorder %s1670_s19, 3 }
   0x5   : > { %s1936_s20 = smov (%p35_p1, %s33_s20), 0  ;;  %p357_p3 = pnand %p1466_p0, %p356_p2 }
   0x6   : > { %p401_p4 = scmp.lt.s32.totalorder (!%p357_p3), %s1662_s17, 1  ;;  %v1672_v0 = vmov (!%p357_p3), 0.0   ;;  %v419_v9 = vld [vmem:[%s1922_s1] sm:$0xf] (!%p357_p3)  ;;  %vm420_vm0 = vcmask (!%p357_p3), 130048   ;;  %v1673_v12 = vmov (!%p357_p3), 0.0|0.0  }
   0x7   : > { %360 = sbr.rel (%p357_p3) target bundleno = 1174 (0x496), region = 64  ;;  %488 = vmatprep.mubr.f32.mxu0 (!%p357_p3), %v1672_v0  ;;  %1566 = vmatprep.subr.bf16.mxu1 (!%p357_p3), %v1673_v12  ;;  %vm1674_vm1 = vmmov (!%p357_p3), 0   ;;  %vm540_vm2 = vcmask (!%p357_p3), 7168   ;;  %vm507_vm3 = vcmask (!%p357_p3), 1043456   ;;  %v1675_v28 = vmov (!%p357_p3), 0   ;;  %v533_v31 = vld [vmem:[%s1927_s6 + $0x38] sm:$0xff] (!%p357_p3) }
   0x8   : > { %1522 = vmatprep.mubr.msk.f32.mxu1 (!%p357_p3), %vm1674_vm1, %v1672_v0  ;;  %1603 = vset.pattern.permute.xlu1 (!%p357_p3), %v1675_v28  ;;  %v535_v29 = vld [vmem:[%s1929_s8] sm:$0x3] (!%p357_p3)  ;;  %s1676_s14 = smov (!%p357_p3), 1   ;;  %v517_v38 = vld [vmem:[%s1925_s4 + $0x8] sm:$0xff] (!%p357_p3)  ;;  %v528_v42 = vld [vmem:[%s1927_s6 + $0x10] sm:$0xff] (!%p357_p3)  ;;  %vm624_vm4 = vcmask (!%p357_p3), 31744  }
   0x9   : > { %1602 = vset.pattern.permute.xlu0 (!%p357_p3), %v1675_v28  ;;  %v513_v30 = vld [vmem:[%s1923_s2] sm:$0xf] (!%p357_p3)  ;;  %v527_v41 = vld [vmem:[%s1927_s6 + $0x8] sm:$0xff] (!%p357_p3)  ;;  %v529_v43 = vld [vmem:[%s1927_s6 + $0x18] sm:$0xff] (!%p357_p3)  ;;  %vm711_vm5 = vcmask (!%p357_p3), 1041408   ;;  %vm707_vm6 = vcmask (!%p357_p3), 15360  }
   0xa   : > { %v516_v37 = vld [vmem:[%s1925_s4] sm:$0xff] (!%p357_p3)  ;;  %v531_v45 = vld [vmem:[%s1927_s6 + $0x28] sm:$0xff] (!%p357_p3)  ;;  %v532_v46 = vld [vmem:[%s1927_s6 + $0x30] sm:$0xff] (!%p357_p3)  ;;  %vm785_vm7 = vcmask (!%p357_p3), 11264  }
   0xb   : > { %v537_v39 = vld [vmem:[%s1931_s10] sm:$0xf] (!%p357_p3)  ;;  %v515_v51 = vld [vmem:[%s1924_s3 + $0x8] sm:$0xff] (!%p357_p3)  ;;  %v520_v52 = vld [vmem:[%s1926_s5 + $0x10] sm:$0xff] (!%p357_p3) }
   0xc   : > { %v526_v40 = vld [vmem:[%s1927_s6] sm:$0xff] (!%p357_p3) }
   0xd   : > { %v530_v44 = vld [vmem:[%s1927_s6 + $0x20] sm:$0xff] (!%p357_p3) }
   0xe   : > { %s1938_s17 = smov (!%p401_p4, %s1662_s17), 1  ;;  %v534_v48 = vld [vmem:[%s1928_s7] sm:$0x3] }
   0xf   : > { %s1493_s21 = sshll.u32 %s1938_s17, 5  ;;  %v514_v50 = vld [vmem:[%s1924_s3] sm:$0xff] }
  0x10   : > { %s408_s24 = scalar_lea.vmem %s1921_s0, %s1493_s21  ;;  %v536_v59 = vld [vmem:[%s1930_s9] sm:$0xf] }
  0x11   : > { %v1763_v1 = vld [vmem:[%s408_s24 + $0x8] sm:$0xff]  ;;  %v1765_v2 = vld [vmem:[%s408_s24 + $0x18] sm:$0xff]  ;;  %v1767_v3 = vld [vmem:[%s408_s24] sm:$0xff] }
  0x12   : > { %v1562_v4 = vpack.c.bf16 %v1765_v2, %v1763_v1  ;;  %v1771_v5 = vld [vmem:[%s408_s24 + $0x10] sm:$0xff]  ;;  %v495_v6 = vadd.f32 %v1763_v1, %v1767_v3  ;;  %v501_v10 = vmax.f32 %v1767_v3, %v1763_v1  ;;  %v518_v62 = vld [vmem:[%s1926_s5] sm:$0xff]  ;;  %s414_s24 = scalar_lea.vmem %s1932_s11, %s1493_s21 }
  0x13   : > { %v1564_v7 = vpack.c.bf16 %v1771_v5, %v1767_v3  ;;  %v498_v8 = vadd.f32 %v1765_v2, %v1771_v5  ;;  %v504_v11 = vmax.f32 %v1771_v5, %v1765_v2  ;;  %v522_v12 = vld [vmem:[%s1926_s5 + $0x20] sm:$0xff] }
  0x14   : > { %1563 = vmatprep.subr.bf16.mxu0 %v1562_v4  ;;  %496 = vadd.xlane.f32.xlu0 %v495_v6 }
  0x15   : > { %1565 = vmatpush1.bf16.msra.mxu0 %v1564_v7 }
  0x16   : > { %1525 = vmatprep.subr.mxu0 %v1672_v0 }
  0x18   : > { %1471 = vmatmul.mubr.msk.f32.vlgmr.msra.gmra.mrb[0].mxu0 %vm420_vm0, %v419_v9  ;;  %499 = vadd.xlane.f32.xlu0 %v498_v8  ;;  %v519_v8 = vld [vmem:[%s1926_s5 + $0x8] sm:$0xff] }
  0x19   : > { %1527 = vmatprep.mubr.msk.f32.mxu0 %vm1674_vm1, %v1672_v0 }
  0x1c   : > { %502 = vmax.xlane.f32.xlu0 %v501_v10 }
  0x20   : > { %505 = vmax.xlane.f32.xlu0 %v504_v11  ;;  %v521_v11 = vld [vmem:[%s1926_s5 + $0x18] sm:$0xff] }
  0x36   : > { %621 = vperm.xlu0 %1602, %v535_v29  }
  0x3a   : > { %1262 = vperm.xlu0 %1602, %v533_v31  }
  0xa1   : > { %v497_v13 = vpop.xlane.xlu0 %496 }
  0xa2   : > { %v538_v14 = vmul.f32 0.00390625, %v497_v13  ;;  %v523_v13 = vld [vmem:[%s1926_s5 + $0x28] sm:$0xff] }
  0xa5   : > { %v500_v15 = vpop.xlane.xlu0 %499 }
  0xa6   : > { %v539_v16 = vmul.f32 0.00390625, %v500_v15  ;;  %v525_v15 = vld [vmem:[%s1926_s5 + $0x38] sm:$0xff] }
  0xa8   : > { %v1567_v17 = vpack.c.bf16 %v539_v16, %v538_v14 }
  0xa9   : > { %v503_v18 = vpop.xlane.xlu0 %502 }
  0xaa   : > { %1568 = vmatpush3.bf16.msra.mxu1 %v1567_v17  ;;  %v541_v19 = vsel %vm540_vm2, %v538_v14, %v503_v18  ;;  %v524_v14 = vld [vmem:[%s1926_s5 + $0x30] sm:$0xff] }
  0xab   : > { %1530 = vmatprep.subr.mxu1 %v1672_v0 }
  0xad   : > { %v506_v20 = vpop.xlane.xlu0 %505  ;;  %1523 = vmatmul.mubr.msk.f32.vlgmr.msra.gmra.mrb[0].mxu1 %vm420_vm0, %v419_v9 }
  0xae   : > { %v542_v21 = vsel %vm540_vm2, %v539_v16, %v506_v20  ;;  %1532 = vmatprep.mubr.msk.f32.mxu1 %vm1674_vm1, %v1672_v0 }
  0xaf   : > { %v1569_v22 = vpack.c.bf16 %v542_v21, %v541_v19 }
  0xb5   : > { %v622_v54 = vpop.permute.xlu0 %621 }
  0xeb   : > { %v490_v23 = vpop.f32.mrb[0].mxu0 }
  0xec   : > { %v508_v24 = vsel %vm507_vm3, %v490_v23, -inf  ;;  %v492_v25 = vpop.f32.mrb[1].mxu0 }
  0xed   : > { %v509_v26 = vsel %vm507_vm3, %v492_v25, -inf }
  0xee   : > { %v510_v27 = vmax.f32 %v508_v24, %v509_v26 }
  0xf0   : > { %511 = vmax.xlane.f32.xlu1 %v510_v27 }
 0x17d   : > { %v512_v32 = vpop.xlane.xlu1 %511 }
 0x17e   : > { %v613_v33 = vadd.f32 %v513_v30, %v512_v32 }
 0x180   : > { %615 = vrot.lane.b32.xlu1 %v613_v33, %s1676_s14  ;;  %v609_v34 = vpop.f32.mrb[0].mxu1 }
 0x181   : > { %v610_v35 = vadd.f32 %v609_v34, %v513_v30  ;;  %v1524_v36 = vpop.f32.mrb[1].mxu1 }
 0x184   : > { %810 = vperm.xlu1 %1603, %v516_v37  }
 0x188   : > { %815 = vperm.xlu1 %1603, %v517_v38  }
 0x18c   : > { %704 = vperm.xlu1 %1603, %v537_v39  }
 0x190   : > { %903 = vperm.xlu1 %1603, %v526_v40  }
 0x194   : > { %908 = vperm.xlu1 %1603, %v527_v41  }
 0x198   : > { %1021 = vperm.xlu1 %1603, %v528_v42  }
 0x19c   : > { %1026 = vperm.xlu1 %1603, %v529_v43  }
 0x1a0   : > { %1139 = vperm.xlu1 %1603, %v530_v44  }
 0x1a4   : > { %1144 = vperm.xlu1 %1603, %v531_v45  }
 0x1a8   : > { %1257 = vperm.xlu1 %1603, %v532_v46   ;;  %v1263_v46 = vpop.permute.xlu0 %1262 }
 0x1f2   : > { %v616_v47 = vpop.permute.xlu1 %615 }
 0x1f3   : > { %v618_v49 = vsel %vm540_vm2, %v610_v35, %v616_v47 }
 0x1f4   : > { %1526 = vmatpush3.msk.msra.mxu0 %vm507_vm3, %v618_v49 }
 0x1f5   : > { %1528 = vmatmul.mubr.msk.f32.vlgmr.msra.gmra.mrb[2].mxu0 %vm624_vm4, %v534_v48  ;;  %1570 = vmatprep.subr.bf16.mxu0 %v1569_v22 }
 0x1f6   : > { %1572 = vmatpush3.bf16.msra.mxu0 %v1569_v22  ;;  %1539 = vmatprep.mubr.msk.f32.mxu0 %vm420_vm0, %v514_v50 }
 0x1f9   : > { %1540 = vmatmul.mubr.msk.f32.vlgmr.msra.gmra.mrb[4].mxu0 %vm420_vm0, %v515_v51 }
 0x1fa   : > { %1549 = vmatprep.mubr.msk.f32.mxu0 %vm624_vm4, %v520_v52 }
 0x203   : > { %v811_v53 = vpop.permute.xlu1 %810 }
 0x207   : > { %v816_v60 = vpop.permute.xlu1 %815 }
 0x20b   : > { %v705_v16 = vpop.permute.xlu1 %704 }
 0x20f   : > { %v904_v17 = vpop.permute.xlu1 %903 }
 0x213   : > { %v909_v18 = vpop.permute.xlu1 %908 }
 0x217   : > { %v1022_v19 = vpop.permute.xlu1 %1021 }
 0x21b   : > { %v1027_v20 = vpop.permute.xlu1 %1026 }
 0x21f   : > { %v1140_v25 = vpop.permute.xlu1 %1139 }
 0x223   : > { %v1145_v37 = vpop.permute.xlu1 %1144 }
 0x2c8   : > { %v697_v55 = vpop.f32.mrb[2].mxu0 }
 0x2c9   : > { %v698_v56 = vadd.f32 %v697_v55, %v622_v54  ;;  %v1529_v57 = vpop.f32.mrb[3].mxu0 }
 0x2cb   : > { %v701_v58 = vmax.f32 %v698_v56, 0.0 }
 0x2cc   : > { %v1541_v61 = vpop.f32.mrb[4].mxu0 }
 0x2cd   : > { %v896_v63 = vadd.f32 %v1541_v61, %v816_v60  ;;  %1531 = vmatpush3.msk.msra.mxu1 %vm711_vm5, %v701_v58  ;;  %v890_v0 = vpop.f32.mrb[5].mxu0 }
 0x2ce   : > { %v891_v4 = vadd.f32 %v890_v0, %v811_v53  ;;  %1533 = vmatmul.mubr.msk.f32.vlgmr.msra.gmra.mrb[2].mxu1 %vm707_vm6, %v536_v59 }
 0x2cf   : > { %v900_v6 = vmax.f32 %v896_v63, 0.0  ;;  %1544 = vmatprep.mubr.msk.f32.mxu1 %vm624_vm4, %v518_v62  ;;  %v1258_v63 = vpop.permute.xlu1 %1257 }
 0x2d0   : > { %v899_v7 = vmax.f32 %v891_v4, 0.0 }
 0x2d1   : > { %v1265_v10 = vrot.slane %v900_v6, 4 }
 0x2d2   : > { %v1029_v9 = vrot.slane %v899_v7, 4  ;;  %1542 = vmatprep.subr.msk.mxu1 %vm507_vm3, %v899_v7 }
 0x2d3   : > { %1543 = vmatpush3.msk.msra.mxu1 %vm507_vm3, %v899_v7 }
 0x2d4   : > { %1545 = vmatmul.mubr.msk.f32.vlgmr.msra.gmra.mrb[4].mxu1 %vm624_vm4, %v519_v8  ;;  %1547 = vmatprep.subr.msk.mxu0 %vm507_vm3, %v1029_v9 }
 0x2d5   : > { %1548 = vmatpush3.msk.msra.mxu0 %vm507_vm3, %v1029_v9  ;;  %1552 = vmatprep.subr.msk.mxu1 %vm507_vm3, %v900_v6 }
 0x2d6   : > { %1550 = vmatmul.mubr.msk.f32.vlgmr.msra.gmra.mrb[6].mxu0 %vm624_vm4, %v521_v11  ;;  %1553 = vmatpush3.msk.msra.mxu1 %vm507_vm3, %v900_v6 }
 0x2d7   : > { %1554 = vmatprep.mubr.msk.f32.mxu1 %vm624_vm4, %v522_v12  ;;  %1557 = vmatprep.subr.msk.mxu0 %vm507_vm3, %v1265_v10 }
 0x2d8   : > { %1555 = vmatmul.mubr.msk.f32.vlgmr.msra.gmra.mrb[6].mxu1 %vm624_vm4, %v523_v13  ;;  %1558 = vmatpush3.msk.msra.mxu0 %vm507_vm3, %v1265_v10 }
 0x2d9   : > { %1559 = vmatprep.mubr.msk.f32.mxu0 %vm624_vm4, %v524_v14 }
 0x2da   : > { %1560 = vmatmul.mubr.msk.f32.vlgmr.msra.gmra.mrb[8].mxu0 %vm624_vm4, %v525_v15 }
 0x3a1   : > { %v781_v21 = vpop.f32.mrb[2].mxu1 }
 0x3a2   : > { %v782_v22 = vadd.f32 %v781_v21, %v705_v16  ;;  %v1534_v23 = vpop.f32.mrb[3].mxu1 }
 0x3a4   : > { %v786_v24 = vsel %vm785_vm7, %v782_v22, -inf }
 0x3a5   : > { %v787_v26 = vrot.slane %v786_v24, 4 }
 0x3a7   : > { %v788_v27 = vmax.f32 %v786_v24, %v787_v26  ;;  %v1546_v28 = vpop.f32.mrb[4].mxu1 }
 0x3a8   : > { %v992_v29 = vadd.f32 %v1546_v28, %v909_v18  ;;  %v986_v30 = vpop.f32.mrb[5].mxu1 }
 0x3a9   : > { %v789_v31 = vrot.slane %v788_v27, 2  ;;  %v987_v32 = vadd.f32 %v986_v30, %v904_v17  ;;  %v1551_v33 = vpop.f32.mrb[6].mxu0 }
 0x3aa   : > { %v996_v34 = vsub.f32 0.0, %v992_v29  ;;  %v1110_v35 = vadd.f32 %v1551_v33, %v1027_v20  ;;  %v1104_v36 = vpop.f32.mrb[7].mxu0 }
 0x3ab   : > { %v790_v38 = vmax.f32 %v788_v27, %v789_v31  ;;  %v995_v39 = vsub.f32 0.0, %v987_v32  ;;  %v1105_v40 = vadd.f32 %v1104_v36, %v1022_v19  ;;  %v1556_v41 = vpop.f32.mrb[6].mxu1 }
 0x3ac   : > { %v999_v42 = vmul.f32 1.442695, %v996_v34  ;;  %v1114_v43 = vsub.f32 0.0, %v1110_v35  ;;  %v1228_v44 = vadd.f32 %v1556_v41, %v1145_v37  ;;  %v1222_v45 = vpop.f32.mrb[7].mxu1 }
 0x3ad   : > { %v791_v47 = vrot.slane %v790_v38, 1  ;;  %v997_v48 = vmul.f32 1.442695, %v995_v39  ;;  %v1113_v49 = vsub.f32 0.0, %v1105_v40  ;;  %v1561_v50 = vpop.f32.mrb[8].mxu0  ;;  %v1223_v61 = vadd.f32 %v1222_v45, %v1140_v25 }
 0x3ae   : > { %1604 = vpow2.f32 %v999_v42  ;;  %v1117_v51 = vmul.f32 1.442695, %v1114_v43  ;;  %v1232_v52 = vsub.f32 0.0, %v1228_v44  ;;  %v1346_v53 = vadd.f32 %v1561_v50, %v1263_v46  ;;  %v1340_v54 = vpop.f32.mrb[9].mxu0 }
 0x3af   : > { %v792_v55 = vmax.f32 %v790_v38, %v791_v47  ;;  %1606 = vpow2.f32 %v997_v48  ;;  %v1115_v56 = vmul.f32 1.442695, %v1113_v49  ;;  %v1231_v4 = vsub.f32 0.0, %v1223_v61 }
 0x3b0   : > { %1608 = vpow2.f32 %v1117_v51  ;;  %v1235_v57 = vmul.f32 1.442695, %v1232_v52  ;;  %v1350_v58 = vsub.f32 0.0, %v1346_v53  ;;  %v1341_v6 = vadd.f32 %v1340_v54, %v1258_v63 }
 0x3b1   : > { %v793_v59 = vsub.f32 %v782_v22, %v792_v55  ;;  %1610 = vpow2.f32 %v1115_v56  ;;  %v1233_v13 = vmul.f32 1.442695, %v1231_v4  ;;  %v1011_v54 = vlaneseq }
 0x3b2   : > { %1612 = vpow2.f32 %v1235_v57  ;;  %v1353_v62 = vmul.f32 1.442695, %v1350_v58  ;;  %v1349_v14 = vsub.f32 0.0, %v1341_v6 }
 0x3b3   : > { %v794_v60 = vmul.f32 1.442695, %v793_v59  ;;  %v1012_v55 = vshrl.u32 %v1011_v54, 7 }
 0x3b4   : > { %v1351_v19 = vmul.f32 1.442695, %v1349_v14 }
 0x3b5   : > { %1614 = vpow2.f32 %v794_v60  ;;  %v1013_v58 = vsub.s32 0, %v1012_v55  ;;  %v1131_v59 = vsub.s32 1, %v1012_v55  ;;  %v1249_v60 = vsub.s32 2, %v1012_v55 }
 0x3b6   : > { %1616 = vpow2.f32 %v1353_v62  ;;  %v1367_v61 = vsub.s32 3, %v1012_v55 }
 0x3b8   : > { %v1605_v0 = vpop.eup %1604 }
 0x3b9   : > { %v1607_v7 = vpop.eup %1606  ;;  %v1002_v8 = vadd.f32 1.0, %v1605_v0 }
 0x3ba   : > { %v1609_v9 = vpop.eup %1608  ;;  %v1001_v10 = vadd.f32 1.0, %v1607_v7 }
 0x3bb   : > { %v1611_v11 = vpop.eup %1610  ;;  %1618 = vrcp.f32 %v1002_v8  ;;  %v1120_v15 = vadd.f32 1.0, %v1609_v9 }
 0x3bc   : > { %v1119_v12 = vadd.f32 1.0, %v1611_v11  ;;  %1620 = vrcp.f32 %v1001_v10  ;;  %v1613_v16 = vpop.eup %1612 }
 0x3bd   : > { %v1238_v21 = vadd.f32 1.0, %v1613_v16 }
 0x3be   : > { %1622 = vrcp.f32 %v1119_v12 }
 0x3bf   : > { %v1615_v17 = vpop.eup %1614  ;;  %1624 = vpow2.f32 %v1233_v13 }
 0x3c0   : > { %v796_v18 = vsel %vm785_vm7, %v1615_v17, 0.0  ;;  %1626 = vrcp.f32 %v1120_v15  ;;  %v1617_v22 = vpop.eup %1616 }
 0x3c1   : > { %v797_v20 = vrot.slane %v796_v18, 4  ;;  %1628 = vpow2.f32 %v1351_v19  ;;  %v1356_v26 = vadd.f32 1.0, %v1617_v22 }
 0x3c2   : > { %1630 = vrcp.f32 %v1238_v21 }
 0x3c3   : > { %v798_v23 = vadd.f32 %v797_v20, %v796_v18  ;;  %1632 = vrcp.f32 %v1356_v26 }
 0x3c5   : > { %v1619_v24 = vpop.eup %1618  ;;  %v799_v25 = vrot.slane %v798_v23, 2 }
 0x3c6   : > { %v1008_v27 = vsel %vm707_vm6, %v1619_v24, 0.0  ;;  %v1621_v28 = vpop.eup %1620 }
 0x3c7   : > { %v800_v29 = vadd.f32 %v799_v25, %v798_v23  ;;  %1009 = vadd.xlane.f32.xlu0 %v1008_v27  ;;  %v1005_v34 = vsel %vm707_vm6, %v1621_v28, 0.0 }
 0x3c8   : > { %v1623_v30 = vpop.eup %1622 }
 0x3c9   : > { %v801_v31 = vrot.slane %v800_v29, 1  ;;  %v1123_v32 = vsel %vm707_vm6, %v1623_v30, 0.0  ;;  %v1625_v33 = vpop.eup %1624 }
 0x3ca   : > { %1124 = vadd.xlane.f32.xlu1 %v1123_v32  ;;  %v1627_v35 = vpop.eup %1626  ;;  %v1237_v37 = vadd.f32 1.0, %v1625_v33 }
 0x3cb   : > { %v802_v36 = vadd.f32 %v801_v31, %v800_v29  ;;  %1006 = vadd.xlane.f32.xlu0 %v1005_v34  ;;  %v1629_v38 = vpop.eup %1628  ;;  %v1126_v39 = vsel %vm707_vm6, %v1627_v35, 0.0 }
 0x3cc   : > { %v1631_v40 = vpop.eup %1630  ;;  %v1355_v41 = vadd.f32 1.0, %v1629_v38 }
 0x3cd   : > { %1634 = vrcp.f32 %v802_v36  ;;  %v1244_v42 = vsel %vm707_vm6, %v1631_v40, 0.0  ;;  %v1633_v43 = vpop.eup %1632 }
 0x3ce   : > { %1636 = vrcp.f32 %v1237_v37  ;;  %v1362_v44 = vsel %vm707_vm6, %v1633_v43, 0.0 }
 0x3cf   : > { %1127 = vadd.xlane.f32.xlu0 %v1126_v39  ;;  %1638 = vrcp.f32 %v1355_v41 }
 0x3d3   : > { %1245 = vadd.xlane.f32.xlu0 %v1244_v42 }
 0x3d7   : > { %v1635_v45 = vpop.eup %1634  ;;  %1363 = vadd.xlane.f32.xlu0 %v1362_v44 }
 0x3d8   : > { %v804_v46 = vmul.f32 %v1635_v45, %v1615_v17  ;;  %v1637_v48 = vpop.eup %1636 }
 0x3d9   : > { %v1241_v49 = vsel %vm707_vm6, %v1637_v48, 0.0  ;;  %v1639_v50 = vpop.eup %1638 }
 0x3da   : > { %v805_v47 = vsel %vm785_vm7, %v804_v46, 0.0  ;;  %v1359_v51 = vsel %vm707_vm6, %v1639_v50, 0.0 }
 0x3db   : > { %806 = vadd.xlane.f32.xlu1 %v805_v47 }
 0x3df   : > { %1242 = vadd.xlane.f32.xlu1 %v1241_v49 }
 0x3e3   : > { %1360 = vadd.xlane.f32.xlu1 %v1359_v51 }
 0x454   : > { %v1010_v52 = vpop.xlane.xlu0 %1009 }
 0x457   : > { %v1125_v57 = vpop.xlane.xlu1 %1124 }
 0x458   : > { %v1007_v53 = vpop.xlane.xlu0 %1006 }
 0x45c   : > { %v1128_v56 = vpop.xlane.xlu0 %1127 }
 0x460   : > { %v1246_v62 = vpop.xlane.xlu0 %1245 }
 0x464   : > { %v1364_v17 = vpop.xlane.xlu0 %1363 }
 0x468   : > { %v807_v63 = vpop.xlane.xlu1 %806 }
 0x469   : > { %v1014_v0 = vrot.slane %v807_v63, %v1013_v58  ;;  %v1132_v4 = vrot.slane %v807_v63, %v1131_v59  ;;  %v1250_v6 = vrot.slane %v807_v63, %v1249_v60  ;;  %v1368_v7 = vrot.slane %v807_v63, %v1367_v61 }
 0x46b   : > { %v1016_v8 = vmul.f32 %v1014_v0, %v1010_v52  ;;  %v1134_v9 = vmul.f32 %v1132_v4, %v1128_v56  ;;  %v1015_v10 = vmul.f32 %v1014_v0, %v1007_v53  ;;  %v1133_v11 = vmul.f32 %v1132_v4, %v1125_v57 }
 0x46c   : > { %v1243_v12 = vpop.xlane.xlu1 %1242  ;;  %v1252_v15 = vmul.f32 %v1250_v6, %v1246_v62  ;;  %v1370_v19 = vmul.f32 %v1368_v7, %v1364_v17 }
 0x46d   : > { %v1135_v13 = vadd.f32 %v1133_v11, %v1015_v10  ;;  %v1136_v14 = vadd.f32 %v1134_v9, %v1016_v8  ;;  %v1251_v16 = vmul.f32 %v1250_v6, %v1243_v12 }
 0x46f   : > { %v1254_v18 = vadd.f32 %v1252_v15, %v1136_v14  ;;  %v1253_v21 = vadd.f32 %v1251_v16, %v1135_v13 }
 0x470   : > { %v1361_v20 = vpop.xlane.xlu1 %1360 }
 0x471   : > { %v1372_v22 = vadd.f32 %v1370_v19, %v1254_v18  ;;  %v1369_v23 = vmul.f32 %v1368_v7, %v1361_v20 }
 0x473   : > { %v1374_v24 = vsub.f32 0.0, %v1372_v22  ;;  %v1371_v25 = vadd.f32 %v1369_v23, %v1253_v21 }
 0x475   : > { %v1377_v26 = vmul.f32 1.442695, %v1374_v24  ;;  %v1373_v27 = vsub.f32 0.0, %v1371_v25 }
 0x477   : > { %1640 = vpow2.f32 %v1377_v26  ;;  %v1375_v28 = vmul.f32 1.442695, %v1373_v27 }
 0x479   : > { %1642 = vpow2.f32 %v1375_v28 }
 0x481   : > { %v1641_v29 = vpop.eup %1640 }
 0x482   : > { %v1380_v30 = vadd.f32 1.0, %v1641_v29 }
 0x483   : > { %v1643_v31 = vpop.eup %1642 }
 0x484   : > { %1644 = vrcp.f32 %v1380_v30  ;;  %v1379_v32 = vadd.f32 1.0, %v1643_v31 }
 0x486   : > { %1646 = vrcp.f32 %v1379_v32 }
 0x48e   : > { %v1645_v33 = vpop.eup %1644 }
 0x48f   : > { %v1384_v34 = vadd.f32 1.0, %v1645_v33 }
 0x490   : > { %v1647_v35 = vpop.eup %1646 }
 0x491   : > { %v1387_v36 = vmul.f32 %v1384_v34, %v1771_v5  ;;  %v1388_v37 = vmul.f32 %v1384_v34, %v1765_v2  ;;  %v1383_v38 = vadd.f32 1.0, %v1647_v35 }
 0x493   : > { %1391 = vst [vmem:[%s414_s24 + $0x10] sm:$0xff] %v1387_v36  ;;  %1392 = vst [vmem:[%s414_s24 + $0x18] sm:$0xff] %v1388_v37  ;;  %v1385_v39 = vmul.f32 %v1383_v38, %v1767_v3  ;;  %v1386_v40 = vmul.f32 %v1383_v38, %v1763_v1 }
 0x495   : > { %1389 = vst [vmem:[%s414_s24] sm:$0xff] %v1385_v39  ;;  %1390 = vst [vmem:[%s414_s24 + $0x8] sm:$0xff] %v1386_v40 }
 0x496 PF: > { %s21_s19 = sadd.s32 1, %s1670_s19   ;;  %s1933_s17 = smov %s1666_s18 }
 0x497   : > { %p18_p5 = scmp.ge.s32.totalorder %s21_s19, 4   ;;  %s1934_s18 = smov %s1936_s20 }
 0x499   :  { %20 = sbr.rel (!%p18_p5) target bundleno = 2 (0x2), region = 94 }

</bundles_post_ra>
